<compile_context>
chip_gen: v7x
topology: tpu7x:2x2x1
jax: 0.10.0
libtpu: 0.0.40
codegen_flags: <defaults>
</compile_context>

<pallas_src>
import jax
import jax.numpy as jnp
from jax.experimental import pallas as pl
from jax.experimental.pallas import tpu as pltpu


def _round_up(x, m):
    return (x + m - 1) // m * m


# ---------------------------------------------------------------------------
# Kernel: K-tiled GEMM with f32 accumulator + bias epilogue.
#   out[i, j] = sum_k x_aug[i, k] @ w_aug[k, j] + bias[j]
# The LoRA path is already fused into x_aug / w_aug by the wrapper.
# ---------------------------------------------------------------------------
def _gemm_bias_kernel(x_ref, w_ref, b_ref, o_ref, acc_ref):
    k = pl.program_id(2)

    @pl.when(k == 0)
    def _():
        acc_ref[...] = jnp.zeros_like(acc_ref)

    acc_ref[...] += jnp.dot(x_ref[...], w_ref[...],
                            preferred_element_type=jnp.float32)

    @pl.when(k == pl.num_programs(2) - 1)
    def _():
        o_ref[...] = (acc_ref[...] + b_ref[...]).astype(o_ref.dtype)


def _device_cfg():
    """Generation-aware tile sizes and VMEM budget."""
    try:
        kind = jax.devices()[0].device_kind.lower()
    except Exception:
        kind = ""
    if "v5 lite" in kind or "v5e" in kind:
        # 4x128x128 MXU; default scoped VMEM is only 16 MiB -> raise it.
        return dict(tm=128, tn=512, tk=512, vmem=96 * 1024 * 1024)
    if "v7" in kind:
        # Only 64 MiB VMEM per TensorCore -> conservative budget/tiles.
        return dict(tm=256, tn=256, tk=512, vmem=56 * 1024 * 1024)
    # v6e / default: 2x256x256 MXU, 128 MiB VMEM.
    return dict(tm=256, tn=512, tk=512, vmem=100 * 1024 * 1024)


def prepare_lora_linear_params(w_base, b_base, w_down, w_up, scale,
                               *, compute_dtype=jnp.bfloat16):
    """One-time weight preprocessing (PyTorch (out, in) weight layout in).

    Returns arrays consumed by `lora_linear_forward`:
      w_aug : (IN + R, OUT) bf16  = [W_base^T ; scale * W_up^T]  (K-fused)
      b     : (1, OUT)      f32
      wd_t  : (COND, R)     bf16   (down projection weight, transposed)
    """
    out_f = w_base.shape[0]
    wb_t = w_base.T.astype(compute_dtype)                                  # (IN, OUT)
    wu_t = (w_up.astype(jnp.float32) * float(scale)).T.astype(compute_dtype)  # (R, OUT)
    return dict(
        w_aug=jnp.concatenate([wb_t, wu_t], axis=0),                       # (IN+R, OUT)
        b=b_base.astype(jnp.float32).reshape(1, out_f),
        wd_t=w_down.T.astype(compute_dtype),                               # (COND, R)
    )


def lora_linear_forward(x, cond, params, *, out_dtype=None,
                        compute_dtype=jnp.bfloat16):
    """x: (..., IN), cond: (..., COND) or None. params from prepare_*()."""
    w_aug = params["w_aug"]          # (IN + R, OUT), scale folded into up rows
    bias = params["b"]               # (1, OUT) f32
    wd_t = params["wd_t"]            # (COND, R)

    lead = x.shape[:-1]
    IN = x.shape[-1]
    R = wd_t.shape[-1]
    OUT = w_aug.shape[-1]
    M = 1
    for d in lead:
        M *= d
    out_dtype = out_dtype or x.dtype
    cbytes = jnp.dtype(compute_dtype).itemsize
    obytes = jnp.dtype(out_dtype).itemsize

    x2 = x.reshape(M, IN).astype(compute_dtype)
    if cond is not None:
        # Hoisted skinny down-projection (M, R); fused onto x along K.
        c2 = cond.reshape(M, -1).astype(compute_dtype)
        down = jnp.dot(c2, wd_t, preferred_element_type=jnp.float32)
        x2 = jnp.concatenate([x2, down.astype(compute_dtype)], axis=-1)
        K = IN + R
    else:
        w_aug = w_aug[:IN]
        K = IN

    cfg = _device_cfg()
    tm = min(cfg["tm"], _round_up(M, 8))
    tn = min(cfg["tn"], _round_up(OUT, 128))
    tk = min(cfg["tk"], _round_up(K, 128))

    def _vmem_need(tm_, tn_, tk_):
        # double-buffered x/w/bias/out blocks + f32 accumulator scratch
        return (2 * (tm_ * tk_ * cbytes + tk_ * tn_ * cbytes + tn_ * 4
                     + tm_ * tn_ * obytes)
                + tm_ * tn_ * 4)

    budget = cfg["vmem"]
    while _vmem_need(tm, tn, tk) > budget and tk > 128:
        tk = max(128, tk // 2)
    while _vmem_need(tm, tn, tk) > budget and tn > 128:
        tn = max(128, tn // 2)
    while _vmem_need(tm, tn, tk) > budget and tm > 8:
        tm = max(8, tm // 2)

    Mp = _round_up(M, tm)
    Kp = _round_up(K, tk)
    OUTp = _round_up(OUT, tn)

    x_p = jnp.pad(x2, ((0, Mp - M), (0, Kp - K)))
    w_p = jnp.pad(w_aug, ((0, Kp - K), (0, OUTp - OUT)))
    b_p = jnp.pad(bias, ((0, 0), (0, OUTp - OUT)))

    grid = (Mp // tm, OUTp // tn, Kp // tk)

    flops = 2 * M * K * OUT
    bytes_accessed = int((x_p.size + w_p.size) * cbytes + b_p.size * 4
                         + Mp * OUTp * obytes)
    cost = pl.CostEstimate(flops=flops, transcendentals=0,
                           bytes_accessed=bytes_accessed)
    vmem_limit = int(min(budget,
                         max(2 * _vmem_need(tm, tn, tk), 16 * 1024 * 1024)))

    out2 = pl.pallas_call(
        _gemm_bias_kernel,
        out_shape=jax.ShapeDtypeStruct((Mp, OUTp), out_dtype),
        grid_spec=pltpu.PrefetchScalarGridSpec(
            num_scalar_prefetch=0,
            grid=grid,
            in_specs=[
                pl.BlockSpec((tm, tk), lambda i, j, k: (i, k)),  # x_aug tile
                pl.BlockSpec((tk, tn), lambda i, j, k: (k, j)),  # w_aug tile
                pl.BlockSpec((1, tn), lambda i, j, k: (0, j)),   # bias N-tile
            ],
            out_specs=pl.BlockSpec((tm, tn), lambda i, j, k: (i, j)),
            scratch_shapes=[pltpu.VMEM((tm, tn), jnp.float32)],
        ),
        compiler_params=pltpu.CompilerParams(
            dimension_semantics=("parallel", "parallel", "arbitrary"),
            vmem_limit_bytes=vmem_limit),
        cost_estimate=cost,
    )(x_p, w_p, b_p)

    return out2[:M, :OUT].reshape(*lead, OUT)


if __name__ == "__main__":
    # Small, lane-friendly shapes consistent with the module
    # (cond_dim default = 512 in the PyTorch spec).
    B, S = 2, 128
    IN_FEATURES = 256
    OUT_FEATURES = 256
    COND_DIM = 512
    RANK = 4
    LORA_ALPHA = 8.0
    scale = LORA_ALPHA / RANK

    key = jax.random.PRNGKey(0)
    k_x, k_c, k_wb, k_bb, k_wd, k_wu = jax.random.split(key, 6)

    x = jax.random.normal(k_x, (B, S, IN_FEATURES), dtype=jnp.float32)
    cond = jax.random.normal(k_c, (B, S, COND_DIM), dtype=jnp.float32)

    # PyTorch stores Linear weights as (out_features, in_features).
    w_base = jax.random.normal(k_wb, (OUT_FEATURES, IN_FEATURES), jnp.float32) * 0.05
    b_base = jax.random.normal(k_bb, (OUT_FEATURES,), jnp.float32) * 0.05
    w_down = jax.random.normal(k_wd, (RANK, COND_DIM), jnp.float32) * 0.05
    w_up = jax.random.normal(k_wu, (OUT_FEATURES, RANK), jnp.float32) * 0.05

    # One-time weight prep (transpose, bf16 cast, scale fold, K-concat).
    params = prepare_lora_linear_params(w_base, b_base, w_down, w_up, scale)

    fwd = jax.jit(lora_linear_forward)
    out = jax.block_until_ready(fwd(x, cond, params))

    # Pure-f32 JAX reference (exact PyTorch semantics). The kernel uses bf16
    # operands with f32 accumulation, so compare at bf16-level tolerance.
    base_ref = jnp.einsum("bsi,oi->bso", x, w_base) + b_base
    lora_ref = jnp.einsum("bsr,or->bso",
                          jnp.einsum("bsc,rc->bsr", cond, w_down), w_up)
    ref = base_ref + scale * lora_ref

    assert out.shape == (B, S, OUT_FEATURES)
    max_err = float(jnp.max(jnp.abs(out - ref)))
    assert jnp.allclose(out, ref, atol=5e-2, rtol=5e-2), max_err

    print("KERNEL_OK")
</pallas_src>

<mosaic_0001>
module attributes {stable_mosaic.version = 11 : i64} {
  func.func @_gemm_bias_kernel(%arg0: i32, %arg1: i32, %arg2: i32, %arg3: memref<256x384xbf16, #tpu.memory_space<vmem>>, %arg4: memref<384x256xbf16, #tpu.memory_space<vmem>>, %arg5: memref<1x256xf32, #tpu.memory_space<vmem>>, %arg6: memref<256x256xf32, #tpu.memory_space<vmem>>, %arg7: memref<256x256xf32, #tpu.memory_space<vmem>>) attributes {dimension_semantics = [#tpu.dimension_semantics<parallel>, #tpu.dimension_semantics<parallel>, #tpu.dimension_semantics<arbitrary>], iteration_bounds = array<i64: 1, 1, 1>, scalar_prefetch = 0 : i64, scratch_operands = 1 : i64, tpu.core_type = #tpu.core_type<tc>, window_params = [{transform_indices = @transform_0, window_bounds = array<i64: 256, 384>}, {transform_indices = @transform_1, window_bounds = array<i64: 384, 256>}, {transform_indices = @transform_2, window_bounds = array<i64: 1, 256>}, {transform_indices = @transform_3, window_bounds = array<i64: 256, 256>}]} {
    %c0_i32 = arith.constant 0 : i32
    %0 = arith.cmpi eq, %arg2, %c0_i32 : i32
    %1 = arith.extui %0 : i1 to i32
    %c0_i32_0 = arith.constant 0 : i32
    %2 = arith.cmpi ne, %1, %c0_i32_0 : i32
    scf.if %2 {
      %cst_10 = arith.constant 0.000000e+00 : f32
      %12 = vector.broadcast %cst_10 : f32 to vector<256x256xf32>
      %c0_11 = arith.constant 0 : index
      %c0_12 = arith.constant 0 : index
      %13 = vector.load %arg7[%c0_11, %c0_12] : memref<256x256xf32, #tpu.memory_space<vmem>>, vector<256x256xf32>
      tpu.vector_store %arg7[%c0_11, %c0_12], %12 {strides = array<i32>} : memref<256x256xf32, #tpu.memory_space<vmem>>, vector<256x256xf32>,
    } else {
    }
    %c0 = arith.constant 0 : index
    %c0_1 = arith.constant 0 : index
    %3 = vector.load %arg7[%c0, %c0_1] : memref<256x256xf32, #tpu.memory_space<vmem>>, vector<256x256xf32>
    %c0_2 = arith.constant 0 : index
    %c0_3 = arith.constant 0 : index
    %4 = vector.load %arg3[%c0_2, %c0_3] : memref<256x384xbf16, #tpu.memory_space<vmem>>, vector<256x384xbf16>
    %c0_4 = arith.constant 0 : index
    %c0_5 = arith.constant 0 : index
    %5 = vector.load %arg4[%c0_4, %c0_5] : memref<384x256xbf16, #tpu.memory_space<vmem>>, vector<384x256xbf16>
    %cst = arith.constant dense<0.000000e+00> : vector<256x256xf32>
    %6 = tpu.matmul %4, %5, %cst {dimension_numbers = #tpu.dot_dimension_numbers<[1], [0], [0], [1], [0, 0, 1, 1], [], []>} : vector<256x384xbf16>, vector<384x256xbf16>, vector<256x256xf32> -> vector<256x256xf32>
    %7 = arith.addf %3, %6 : vector<256x256xf32>
    %c0_6 = arith.constant 0 : index
    %c0_7 = arith.constant 0 : index
    %8 = vector.load %arg7[%c0_6, %c0_7] : memref<256x256xf32, #tpu.memory_space<vmem>>, vector<256x256xf32>
    tpu.vector_store %arg7[%c0_6, %c0_7], %7 {strides = array<i32>} : memref<256x256xf32, #tpu.memory_space<vmem>>, vector<256x256xf32>,
    %c0_i32_8 = arith.constant 0 : i32
    %9 = arith.cmpi eq, %arg2, %c0_i32_8 : i32
    %10 = arith.extui %9 : i1 to i32
    %c0_i32_9 = arith.constant 0 : i32
    %11 = arith.cmpi ne, %10, %c0_i32_9 : i32
    scf.if %11 {
      %c0_10 = arith.constant 0 : index
      %c0_11 = arith.constant 0 : index
      %12 = vector.load %arg7[%c0_10, %c0_11] : memref<256x256xf32, #tpu.memory_space<vmem>>, vector<256x256xf32>
      %c0_12 = arith.constant 0 : index
      %c0_13 = arith.constant 0 : index
      %13 = vector.load %arg5[%c0_12, %c0_13] : memref<1x256xf32, #tpu.memory_space<vmem>>, vector<1x256xf32>
      %14 = vector.broadcast %13 : vector<1x256xf32> to vector<256x256xf32>
      %15 = arith.addf %12, %14 : vector<256x256xf32>
      %c0_14 = arith.constant 0 : index
      %c0_15 = arith.constant 0 : index
      %16 = vector.load %arg6[%c0_14, %c0_15] : memref<256x256xf32, #tpu.memory_space<vmem>>, vector<256x256xf32>
      tpu.vector_store %arg6[%c0_14, %c0_15], %15 {strides = array<i32>} : memref<256x256xf32, #tpu.memory_space<vmem>>, vector<256x256xf32>,
    } else {
    }
    return
  }
  func.func @transform_0(%arg0: i32, %arg1: i32, %arg2: i32) -> (i32, i32) {
    %c0_i32 = arith.constant 0 : i32
    return %arg0, %arg2 : i32, i32
  }
  func.func @transform_1(%arg0: i32, %arg1: i32, %arg2: i32) -> (i32, i32) {
    %c0_i32 = arith.constant 0 : i32
    return %arg2, %arg1 : i32, i32
  }
  func.func @transform_2(%arg0: i32, %arg1: i32, %arg2: i32) -> (i32, i32) {
    %c0_i32 = arith.constant 0 : i32
    %c0_i32_0 = arith.constant 0 : i32
    return %c0_i32, %arg1 : i32, i32
  }
  func.func @transform_3(%arg0: i32, %arg1: i32, %arg2: i32) -> (i32, i32) {
    %c0_i32 = arith.constant 0 : i32
    return %arg0, %arg1 : i32, i32
  }
}

</mosaic_0001>

<bundles_post_ra>
// kernel: lora_linear_forward.1
= control target key start
LH: loop header
LB: loop body
LE: loop exit
PB: predicated region body
PF: predicated region fallthrough
CT: control target
= control target key end

     0   :  { %v1817_v2 = vmov 0   ;;  %s2228_s0 = inlined_call_operand.vmem [shape: bf16[256,384], index: 0, kind: input, shape index: {}]   ;;  %s2229_s1 = inlined_call_operand.vmem [shape: bf16[384,256], index: 1, kind: input, shape index: {}]   ;;  %s2230_s2 = inlined_call_operand.vmem [shape: f32[1,256], index: 2, kind: input, shape index: {}]   ;;  %s2231_s3 = inlined_call_operand.hbm [shape: f32[256,256], index: 3, kind: output, shape index: {}]  }
   0x1   :  { %v1657_v0 = vld [vmem:[%s2229_s1 + $0x4] ss:$8 sps:$4 sm:$0xff]   ;;  %v1659_v1 = vld [vmem:[%s2229_s1] ss:$8 sps:$4 sm:$0xff]   ;;  %981 = vmatprep.mubr.bf16.mxu0 %v1817_v2  ;;  %v1660_v3 = vld [vmem:[%s2229_s1 + $0x14] ss:$8 sps:$4 sm:$0xff]  }
   0x2   :  { %756 = vmatprep.subr.bf16.mxu1 %v1657_v0  ;;  %v1662_v4 = vld [vmem:[%s2229_s1 + $0x10] ss:$8 sps:$4 sm:$0xff]   ;;  %v1663_v5 = vld [vmem:[%s2229_s1 + $0x24] ss:$8 sps:$4 sm:$0xff]   ;;  %v1665_v6 = vld [vmem:[%s2229_s1 + $0x20] ss:$8 sps:$4 sm:$0xff]  }
   0x3   :  { %757 = vmatpush1.bf16.msra.mxu1 %v1659_v1  ;;  %v1666_v7 = vld [vmem:[%s2229_s1 + $0x34] ss:$8 sps:$4 sm:$0xff]   ;;  %v1668_v8 = vld [vmem:[%s2229_s1 + $0x30] ss:$8 sps:$4 sm:$0xff]   ;;  %v1681_v9 = vld [vmem:[%s2229_s1 + $0x104] ss:$8 sps:$4 sm:$0xff]  }
   0x4   :  { %758 = vmatprep.subr.bf16.mxu1 %v1660_v3  ;;  %v1683_v10 = vld [vmem:[%s2229_s1 + $0x100] ss:$8 sps:$4 sm:$0xff]   ;;  %v1669_v11 = vld [vmem:[%s2229_s1 + $0x44] ss:$8 sps:$4 sm:$0xff]   ;;  %949 = vmatprep.subr.bf16.mxu0 %v1681_v9  ;;  %v1687_v12 = vld [vmem:[%s2229_s1 + $0x114] ss:$8 sps:$4 sm:$0xff]  }
   0x5   :  { %950 = vmatpush1.bf16.msra.mxu0 %v1683_v10  ;;  %v1689_v13 = vld [vmem:[%s2229_s1 + $0x110] ss:$8 sps:$4 sm:$0xff]   ;;  %v1671_v14 = vld [vmem:[%s2229_s1 + $0x40] ss:$8 sps:$4 sm:$0xff]   ;;  %v1672_v15 = vld [vmem:[%s2229_s1 + $0x54] ss:$8 sps:$4 sm:$0xff]  }
   0x6   :  { %951 = vmatprep.subr.bf16.mxu0 %v1687_v12  ;;  %v1693_v16 = vld [vmem:[%s2229_s1 + $0x124] ss:$8 sps:$4 sm:$0xff]   ;;  %v1695_v17 = vld [vmem:[%s2229_s1 + $0x120] ss:$8 sps:$4 sm:$0xff]   ;;  %v1674_v18 = vld [vmem:[%s2229_s1 + $0x50] ss:$8 sps:$4 sm:$0xff]  }
   0x7   :  { %759 = vmatpush1.bf16.msra.mxu1 %v1662_v4  ;;  %v1699_v19 = vld [vmem:[%s2229_s1 + $0x134] ss:$8 sps:$4 sm:$0xff]   ;;  %v1675_v20 = vld [vmem:[%s2229_s1 + $0x64] ss:$8 sps:$4 sm:$0xff]   ;;  %v1701_v21 = vld [vmem:[%s2229_s1 + $0x130] ss:$8 sps:$4 sm:$0xff]  }
   0x8   :  { %760 = vmatprep.subr.bf16.mxu1 %v1663_v5  ;;  %v1677_v22 = vld [vmem:[%s2229_s1 + $0x60] ss:$8 sps:$4 sm:$0xff]   ;;  %v1705_v23 = vld [vmem:[%s2229_s1 + $0x144] ss:$8 sps:$4 sm:$0xff]   ;;  %v1678_v24 = vld [vmem:[%s2229_s1 + $0x74] ss:$8 sps:$4 sm:$0xff]  }
   0x9   :  { %952 = vmatpush1.bf16.msra.mxu0 %v1689_v13  ;;  %v1707_v25 = vld [vmem:[%s2229_s1 + $0x140] ss:$8 sps:$4 sm:$0xff]   ;;  %v1680_v26 = vld [vmem:[%s2229_s1 + $0x70] ss:$8 sps:$4 sm:$0xff]   ;;  %v1711_v27 = vld [vmem:[%s2229_s1 + $0x154] ss:$8 sps:$4 sm:$0xff]  }
   0xa   :  { %953 = vmatprep.subr.bf16.mxu0 %v1693_v16  ;;  %v1684_v28 = vld [vmem:[%s2229_s1 + $0x84] ss:$8 sps:$4 sm:$0xff]   ;;  %v1713_v29 = vld [vmem:[%s2229_s1 + $0x150] ss:$8 sps:$4 sm:$0xff]   ;;  %v1686_v30 = vld [vmem:[%s2229_s1 + $0x80] ss:$8 sps:$4 sm:$0xff]  }
   0xb   :  { %761 = vmatpush1.bf16.msra.mxu1 %v1665_v6  ;;  %v1717_v31 = vld [vmem:[%s2229_s1 + $0x164] ss:$8 sps:$4 sm:$0xff]   ;;  %v1690_v32 = vld [vmem:[%s2229_s1 + $0x94] ss:$8 sps:$4 sm:$0xff]   ;;  %v1692_v33 = vld [vmem:[%s2229_s1 + $0x90] ss:$8 sps:$4 sm:$0xff]  }
   0xc   :  { %762 = vmatprep.subr.bf16.mxu1 %v1666_v7  ;;  %v1719_v34 = vld [vmem:[%s2229_s1 + $0x160] ss:$8 sps:$4 sm:$0xff]   ;;  %v1732_v35 = vld [vmem:[%s2228_s0 + $0x4] ss:$12 sps:$4 sm:$0xff]   ;;  %v1723_v36 = vld [vmem:[%s2229_s1 + $0x174] ss:$8 sps:$4 sm:$0xff]  }
   0xd   :  { %954 = vmatpush1.bf16.msra.mxu0 %v1695_v17  ;;  %v1696_v37 = vld [vmem:[%s2229_s1 + $0xa4] ss:$8 sps:$4 sm:$0xff]   ;;  %788 = vmatprep.mubr.bf16.mxu1 %v1732_v35  ;;  %v1725_v38 = vld [vmem:[%s2229_s1 + $0x170] ss:$8 sps:$4 sm:$0xff]   ;;  %v1698_v39 = vld [vmem:[%s2229_s1 + $0xa0] ss:$8 sps:$4 sm:$0xff]  }
   0xe   :  { %955 = vmatprep.subr.bf16.mxu0 %v1699_v19  ;;  %v1702_v40 = vld [vmem:[%s2229_s1 + $0xb4] ss:$8 sps:$4 sm:$0xff]   ;;  %v1704_v42 = vld [vmem:[%s2229_s1 + $0xb0] ss:$8 sps:$4 sm:$0xff]   ;;  %v1708_v43 = vld [vmem:[%s2229_s1 + $0xc4] ss:$8 sps:$4 sm:$0xff]  }
   0xf   :  { %763 = vmatpush1.bf16.msra.mxu1 %v1668_v8  ;;  %v1729_v41 = vld [vmem:[%s2228_s0 + $0x8] ss:$12 sps:$4 sm:$0xff]   ;;  %v1733_v46 = vld [vmem:[%s2228_s0 + $0x20] ss:$12 sps:$4 sm:$0xff]   ;;  %v1716_v47 = vld [vmem:[%s2229_s1 + $0xd0] ss:$8 sps:$4 sm:$0xff]  }
  0x10   :  { %764 = vmatprep.subr.bf16.mxu1 %v1669_v11  ;;  %v1710_v44 = vld [vmem:[%s2229_s1 + $0xc0] ss:$8 sps:$4 sm:$0xff]   ;;  %v1714_v45 = vld [vmem:[%s2229_s1 + $0xd4] ss:$8 sps:$4 sm:$0xff]   ;;  %v1720_v48 = vld [vmem:[%s2229_s1 + $0xe4] ss:$8 sps:$4 sm:$0xff]  }
  0x11   :  { %956 = vmatpush1.bf16.msra.mxu0 %v1701_v21  ;;  %v1722_v49 = vld [vmem:[%s2229_s1 + $0xe0] ss:$8 sps:$4 sm:$0xff]   ;;  %v1726_v50 = vld [vmem:[%s2229_s1 + $0xf4] ss:$8 sps:$4 sm:$0xff]   ;;  %v1737_v51 = vld [vmem:[%s2228_s0 + $0x38] ss:$12 sps:$4 sm:$0xff]  }
  0x12   :  { %957 = vmatprep.subr.bf16.mxu0 %v1705_v23  ;;  %v1728_v52 = vld [vmem:[%s2229_s1 + $0xf0] ss:$8 sps:$4 sm:$0xff]   ;;  %v1730_v53 = vld [vmem:[%s2228_s0] ss:$12 sps:$4 sm:$0xff]   ;;  %v1734_v54 = vld [vmem:[%s2228_s0 + $0x1c] ss:$12 sps:$4 sm:$0xff]  }
  0x13   :  { %765 = vmatpush1.bf16.msra.mxu1 %v1671_v14  ;;  %v1741_v55 = vld [vmem:[%s2228_s0 + $0x50] ss:$12 sps:$4 sm:$0xff]  }
  0x14   :  { %766 = vmatprep.subr.bf16.mxu1 %v1672_v15 }
  0x15   :  { %958 = vmatpush1.bf16.msra.mxu0 %v1707_v25 }
  0x16   :  { %959 = vmatprep.subr.bf16.mxu0 %v1711_v27 }
  0x17   :  { %767 = vmatpush1.bf16.msra.mxu1 %v1674_v18 }
  0x18   :  { %768 = vmatprep.subr.bf16.mxu1 %v1675_v20 }
  0x19   :  { %960 = vmatpush1.bf16.msra.mxu0 %v1713_v29 }
  0x1a   :  { %961 = vmatprep.subr.bf16.mxu0 %v1717_v31 }
  0x1b   :  { %769 = vmatpush1.bf16.msra.mxu1 %v1677_v22 }
  0x1c   :  { %770 = vmatprep.subr.bf16.mxu1 %v1678_v24 }
  0x1d   :  { %962 = vmatpush1.bf16.msra.mxu0 %v1719_v34 }
  0x1e   :  { %963 = vmatprep.subr.bf16.mxu0 %v1723_v36 }
  0x1f   :  { %771 = vmatpush1.bf16.msra.mxu1 %v1680_v26 }
  0x20   :  { %772 = vmatprep.subr.bf16.mxu1 %v1684_v28 }
  0x21   :  { %964 = vmatpush1.bf16.msra.mxu0 %v1725_v38 }
  0x23   :  { %773 = vmatpush1.bf16.msra.mxu1 %v1686_v30 }
  0x24   :  { %774 = vmatprep.subr.bf16.mxu1 %v1690_v32  ;;  %982 = vmatmul.mubr.bf16.vlgmr.msra.gmra.mrb[0].mxu0 %v1729_v41 }
  0x25   :  { %991 = vmatprep.mubr.bf16.mxu0 %v1817_v2 }
  0x27   :  { %775 = vmatpush1.bf16.msra.mxu1 %v1692_v33 }
  0x28   :  { %776 = vmatprep.subr.bf16.mxu1 %v1696_v37 }
  0x2b   :  { %777 = vmatpush1.bf16.msra.mxu1 %v1698_v39 }
  0x2c   :  { %778 = vmatprep.subr.bf16.mxu1 %v1702_v40  ;;  %992 = vmatmul.mubr.bf16.gmra.mrb[4].mxu0 %v1733_v46 }
  0x2d   :  { %1001 = vmatprep.mubr.bf16.mxu0 %v1817_v2 }
  0x2f   :  { %779 = vmatpush1.bf16.msra.mxu1 %v1704_v42 }
  0x30   :  { %780 = vmatprep.subr.bf16.mxu1 %v1708_v43 }
  0x33   :  { %781 = vmatpush1.bf16.msra.mxu1 %v1710_v44 }
  0x34   :  { %782 = vmatprep.subr.bf16.mxu1 %v1714_v45  ;;  %1002 = vmatmul.mubr.bf16.gmra.mrb[8].mxu0 %v1737_v51 }
  0x35   :  { %1011 = vmatprep.mubr.bf16.mxu0 %v1817_v2 }
  0x37   :  { %783 = vmatpush1.bf16.msra.mxu1 %v1716_v47 }
  0x38   :  { %784 = vmatprep.subr.bf16.mxu1 %v1720_v48 }
  0x3b   :  { %785 = vmatpush1.bf16.msra.mxu1 %v1722_v49 }
  0x3c   :  { %786 = vmatprep.subr.bf16.mxu1 %v1726_v50  ;;  %1012 = vmatmul.mubr.bf16.gmra.mrb[12].mxu0 %v1741_v55 }
  0x3f   :  { %787 = vmatpush1.bf16.msra.mxu1 %v1728_v52 }
  0x42   :  { %789 = vmatmul.mubr.bf16.vlgmr.msra.gmra.mrb[0].mxu1 %v1730_v53 }
  0x43   :  { %798 = vmatprep.mubr.bf16.mxu1 %v1734_v54 }
  0x44   :  { %8 = vsyncpa [#allocation4], 0  ;;  %v1736_v56 = vld [vmem:[%s2228_s0 + $0x18] ss:$12 sps:$4 sm:$0xff]   ;;  %1021 = vmatprep.mubr.bf16.mxu0 %v1817_v2  ;;  %v1738_v57 = vld [vmem:[%s2228_s0 + $0x34] ss:$12 sps:$4 sm:$0xff]   ;;  %v1339_v37 = vlaneseq }
  0x45   :  { %v1745_v58 = vld [vmem:[%s2228_s0 + $0x68] ss:$12 sps:$4 sm:$0xff]   ;;  %v1740_v59 = vld [vmem:[%s2228_s0 + $0x30] ss:$12 sps:$4 sm:$0xff]   ;;  %v1742_v60 = vld [vmem:[%s2228_s0 + $0x4c] ss:$12 sps:$4 sm:$0xff]  }
  0x46   :  { %1022 = vmatmul.mubr.bf16.gmra.mrb[16].mxu0 %v1745_v58  ;;  %v1749_v61 = vld [vmem:[%s2228_s0 + $0x80] ss:$12 sps:$4 sm:$0xff]   ;;  %v1744_v62 = vld [vmem:[%s2228_s0 + $0x48] ss:$12 sps:$4 sm:$0xff]   ;;  %v1746_v63 = vld [vmem:[%s2228_s0 + $0x64] ss:$12 sps:$4 sm:$0xff]  }
  0x47   :  { %1031 = vmatprep.mubr.bf16.mxu0 %v1817_v2  ;;  %v1753_v0 = vld [vmem:[%s2228_s0 + $0x98] ss:$12 sps:$4 sm:$0xff]   ;;  %v1748_v1 = vld [vmem:[%s2228_s0 + $0x60] ss:$12 sps:$4 sm:$0xff]   ;;  %v1750_v3 = vld [vmem:[%s2228_s0 + $0x7c] ss:$12 sps:$4 sm:$0xff]  }
  0x48   :  { %v1757_v4 = vld [vmem:[%s2228_s0 + $0xb0] ss:$12 sps:$4 sm:$0xff]   ;;  %v1752_v5 = vld [vmem:[%s2228_s0 + $0x78] ss:$12 sps:$4 sm:$0xff]   ;;  %v1754_v6 = vld [vmem:[%s2228_s0 + $0x94] ss:$12 sps:$4 sm:$0xff]  }
  0x49   :  { %v1761_v7 = vld [vmem:[%s2228_s0 + $0xc8] ss:$12 sps:$4 sm:$0xff]   ;;  %v1756_v8 = vld [vmem:[%s2228_s0 + $0x90] ss:$12 sps:$4 sm:$0xff]   ;;  %v1758_v9 = vld [vmem:[%s2228_s0 + $0xac] ss:$12 sps:$4 sm:$0xff]  }
  0x4a   :  { %799 = vmatmul.mubr.bf16.gmra.mrb[4].mxu1 %v1736_v56  ;;  %v1765_v10 = vld [vmem:[%s2228_s0 + $0xe0] ss:$12 sps:$4 sm:$0xff]   ;;  %v1760_v11 = vld [vmem:[%s2228_s0 + $0xa8] ss:$12 sps:$4 sm:$0xff]   ;;  %v1762_v12 = vld [vmem:[%s2228_s0 + $0xc4] ss:$12 sps:$4 sm:$0xff]  }
  0x4b   :  { %808 = vmatprep.mubr.bf16.mxu1 %v1738_v57  ;;  %v1769_v13 = vld [vmem:[%s2228_s0 + $0xf8] ss:$12 sps:$4 sm:$0xff]   ;;  %v1764_v14 = vld [vmem:[%s2228_s0 + $0xc0] ss:$12 sps:$4 sm:$0xff]   ;;  %v1766_v15 = vld [vmem:[%s2228_s0 + $0xdc] ss:$12 sps:$4 sm:$0xff]  }
  0x4c   :  { %v1773_v16 = vld [vmem:[%s2228_s0 + $0x110] ss:$12 sps:$4 sm:$0xff]   ;;  %v1768_v17 = vld [vmem:[%s2228_s0 + $0xd8] ss:$12 sps:$4 sm:$0xff]   ;;  %v1770_v18 = vld [vmem:[%s2228_s0 + $0xf4] ss:$12 sps:$4 sm:$0xff]  }
  0x4d   :  { %v1777_v19 = vld [vmem:[%s2228_s0 + $0x128] ss:$12 sps:$4 sm:$0xff]   ;;  %v1772_v20 = vld [vmem:[%s2228_s0 + $0xf0] ss:$12 sps:$4 sm:$0xff]   ;;  %v1774_v21 = vld [vmem:[%s2228_s0 + $0x10c] ss:$12 sps:$4 sm:$0xff]  }
  0x4e   :  { %1032 = vmatmul.mubr.bf16.gmra.mrb[20].mxu0 %v1749_v61  ;;  %v1781_v22 = vld [vmem:[%s2228_s0 + $0x140] ss:$12 sps:$4 sm:$0xff]   ;;  %v1776_v23 = vld [vmem:[%s2228_s0 + $0x108] ss:$12 sps:$4 sm:$0xff]   ;;  %v1778_v24 = vld [vmem:[%s2228_s0 + $0x124] ss:$12 sps:$4 sm:$0xff]  }
  0x4f   :  { %1041 = vmatprep.mubr.bf16.mxu0 %v1817_v2  ;;  %v1785_v25 = vld [vmem:[%s2228_s0 + $0x158] ss:$12 sps:$4 sm:$0xff]   ;;  %v1780_v26 = vld [vmem:[%s2228_s0 + $0x120] ss:$12 sps:$4 sm:$0xff]   ;;  %v1782_v27 = vld [vmem:[%s2228_s0 + $0x13c] ss:$12 sps:$4 sm:$0xff]  }
  0x50   :  { %v1789_v28 = vld [vmem:[%s2228_s0 + $0x170] ss:$12 sps:$4 sm:$0xff]   ;;  %v1784_v29 = vld [vmem:[%s2228_s0 + $0x138] ss:$12 sps:$4 sm:$0xff]   ;;  %v1786_v30 = vld [vmem:[%s2228_s0 + $0x154] ss:$12 sps:$4 sm:$0xff]  }
  0x51   :  { %v1790_v31 = vld [vmem:[%s2228_s0 + $0x16c] ss:$12 sps:$4 sm:$0xff]   ;;  %v1792_v32 = vld [vmem:[%s2228_s0 + $0x168] ss:$12 sps:$4 sm:$0xff]   ;;  %v1340_v42 = vshrl.u32 %v1339_v37, 7 }
  0x52   :  { %809 = vmatmul.mubr.bf16.gmra.mrb[8].mxu1 %v1740_v59  ;;  %v1337_v45 = vld [vmem:[%s2230_s2] sm:$0x3] }
  0x53   :  { %818 = vmatprep.mubr.bf16.mxu1 %v1742_v60  ;;  %v1341_v43 = vsub.s32 0, %v1340_v42  ;;  %v1345_v46 = vsub.s32 1, %v1340_v42 }
  0x55   :  { %v2148_v50 = vrot.slane %v1337_v45, %v1341_v43  ;;  %v2150_v52 = vrot.slane %v1337_v45, %v1345_v46 }
  0x56   :  { %1042 = vmatmul.mubr.bf16.gmra.mrb[24].mxu0 %v1753_v0 }
  0x57   :  { %1051 = vmatprep.mubr.bf16.mxu0 %v1817_v2 }
  0x5a   :  { %819 = vmatmul.mubr.bf16.gmra.mrb[12].mxu1 %v1744_v62 }
  0x5b   :  { %828 = vmatprep.mubr.bf16.mxu1 %v1746_v63 }
  0x5e   :  { %1052 = vmatmul.mubr.bf16.gmra.mrb[28].mxu0 %v1757_v4 }
  0x5f   :  { %1061 = vmatprep.mubr.bf16.mxu0 %v1817_v2 }
  0x62   :  { %829 = vmatmul.mubr.bf16.gmra.mrb[16].mxu1 %v1748_v1 }
  0x63   :  { %838 = vmatprep.mubr.bf16.mxu1 %v1750_v3 }
  0x66   :  { %1062 = vmatmul.mubr.bf16.gmra.mrb[32].mxu0 %v1761_v7 }
  0x67   :  { %1071 = vmatprep.mubr.bf16.mxu0 %v1817_v2 }
  0x6a   :  { %839 = vmatmul.mubr.bf16.gmra.mrb[20].mxu1 %v1752_v5 }
  0x6b   :  { %848 = vmatprep.mubr.bf16.mxu1 %v1754_v6 }
  0x6e   :  { %1072 = vmatmul.mubr.bf16.gmra.mrb[36].mxu0 %v1765_v10 }
  0x6f   :  { %1081 = vmatprep.mubr.bf16.mxu0 %v1817_v2 }
  0x72   :  { %849 = vmatmul.mubr.bf16.gmra.mrb[24].mxu1 %v1756_v8 }
  0x73   :  { %858 = vmatprep.mubr.bf16.mxu1 %v1758_v9 }
  0x76   :  { %1082 = vmatmul.mubr.bf16.gmra.mrb[40].mxu0 %v1769_v13 }
  0x77   :  { %1091 = vmatprep.mubr.bf16.mxu0 %v1817_v2 }
  0x7a   :  { %859 = vmatmul.mubr.bf16.gmra.mrb[28].mxu1 %v1760_v11 }
  0x7b   :  { %868 = vmatprep.mubr.bf16.mxu1 %v1762_v12 }
  0x7e   :  { %1092 = vmatmul.mubr.bf16.gmra.mrb[44].mxu0 %v1773_v16 }
  0x7f   :  { %1101 = vmatprep.mubr.bf16.mxu0 %v1817_v2 }
  0x82   :  { %869 = vmatmul.mubr.bf16.gmra.mrb[32].mxu1 %v1764_v14 }
  0x83   :  { %878 = vmatprep.mubr.bf16.mxu1 %v1766_v15 }
  0x86   :  { %1102 = vmatmul.mubr.bf16.gmra.mrb[48].mxu0 %v1777_v19 }
  0x87   :  { %1111 = vmatprep.mubr.bf16.mxu0 %v1817_v2 }
  0x8a   :  { %879 = vmatmul.mubr.bf16.gmra.mrb[36].mxu1 %v1768_v17 }
  0x8b   :  { %888 = vmatprep.mubr.bf16.mxu1 %v1770_v18 }
  0x8e   :  { %1112 = vmatmul.mubr.bf16.gmra.mrb[52].mxu0 %v1781_v22 }
  0x8f   :  { %1121 = vmatprep.mubr.bf16.mxu0 %v1817_v2 }
  0x92   :  { %889 = vmatmul.mubr.bf16.gmra.mrb[40].mxu1 %v1772_v20 }
  0x93   :  { %898 = vmatprep.mubr.bf16.mxu1 %v1774_v21 }
  0x96   :  { %1122 = vmatmul.mubr.bf16.gmra.mrb[56].mxu0 %v1785_v25 }
  0x97   :  { %1131 = vmatprep.mubr.bf16.mxu0 %v1817_v2  ;;  %v1788_v2 = vld [vmem:[%s2228_s0 + $0x150] ss:$12 sps:$4 sm:$0xff]   ;;  %s1818_s0 = smov [#allocation3]  }
  0x98   :  { %s1482_s2 = sshll.u32 %s1818_s0, 4  ;;  %s1483_s2 = int_to_ptr.vmem [resolvable:$true] %s1482_s2 }
  0x99   :  { %s1793_s1 = scalar_lea.vmem %s1483_s2, 8192  ;;  %p1798_p1 = scmp.lt.s32.totalorder %s1483_s2, %s1483_s2 }
  0x9a   :  { %899 = vmatmul.mubr.bf16.gmra.mrb[44].mxu1 %v1776_v23  ;;  %p1794_p0 = scmp.ne.s32.totalorder %s1483_s2, %s1793_s1  ;;  %p1799_p2 = scmp.lt.s32.totalorder %s1793_s1, %s1793_s1 }
  0x9b   :  { %908 = vmatprep.mubr.bf16.mxu1 %v1778_v24 }
  0x9c   :  { %p1800_p3 = por %p1799_p2, %p1798_p1 }
  0x9e   :  { %1132 = vmatmul.mubr.bf16.gmra.mrb[60].mxu0 %v1789_v28  ;;  %p1801_p4 = pnand %p1800_p3, %p1794_p0 }
  0xa2   :  { %909 = vmatmul.mubr.bf16.gmra.mrb[48].mxu1 %v1780_v26 }
  0xa3   :  { %918 = vmatprep.mubr.bf16.mxu1 %v1782_v27 }
  0xaa   :  { %919 = vmatmul.mubr.bf16.gmra.mrb[52].mxu1 %v1784_v29 }
  0xab   :  { %928 = vmatprep.mubr.bf16.mxu1 %v1786_v30 }
  0xb2   :  { %929 = vmatmul.mubr.bf16.gmra.mrb[56].mxu1 %v1788_v2 }
  0xb3   :  { %938 = vmatprep.mubr.bf16.mxu1 %v1790_v31 }
  0xba   :  { %939 = vmatmul.mubr.bf16.gmra.mrb[60].mxu1 %v1792_v32 }
  0xf7   :  { %v983_v33 = vpop.f32.mrb[0].mxu0 }
  0xf8   :  { %v985_v34 = vpop.f32.mrb[1].mxu0 }
  0xf9   :  { %v987_v35 = vpop.f32.mrb[2].mxu0 }
  0xfa   :  { %v989_v36 = vpop.f32.mrb[3].mxu0 }
  0xff   :  { %v993_v38 = vpop.f32.mrb[4].mxu0 }
 0x100   :  { %v995_v39 = vpop.f32.mrb[5].mxu0 }
 0x101   :  { %v997_v40 = vpop.f32.mrb[6].mxu0 }
 0x102   :  { %v999_v41 = vpop.f32.mrb[7].mxu0 }
 0x107   :  { %v1003_v44 = vpop.f32.mrb[8].mxu0 }
 0x108   :  { %v1005_v47 = vpop.f32.mrb[9].mxu0 }
 0x109   :  { %v1007_v48 = vpop.f32.mrb[10].mxu0 }
 0x10a   :  { %v1009_v49 = vpop.f32.mrb[11].mxu0 }
 0x10f   :  { %v1013_v60 = vpop.f32.mrb[12].mxu0 }
 0x110   :  { %v1015_v63 = vpop.f32.mrb[13].mxu0 }
 0x111   :  { %v1017_v1 = vpop.f32.mrb[14].mxu0 }
 0x112   :  { %v1019_v4 = vpop.f32.mrb[15].mxu0 }
 0x115   :  { %v790_v51 = vpop.f32.mrb[0].mxu1 }
 0x116   :  { %v984_v53 = vadd.f32 %v983_v33, %v790_v51  ;;  %v792_v54 = vpop.f32.mrb[1].mxu1 }
 0x117   :  { %v986_v55 = vadd.f32 %v985_v34, %v792_v54  ;;  %v794_v56 = vpop.f32.mrb[2].mxu1 }
 0x118   :  { %v1349_v57 = vadd.f32 %v2148_v50, %v984_v53  ;;  %v988_v58 = vadd.f32 %v987_v35, %v794_v56  ;;  %v796_v59 = vpop.f32.mrb[3].mxu1 }
 0x119   :  { %v1350_v61 = vadd.f32 %v2150_v52, %v986_v55  ;;  %v990_v62 = vadd.f32 %v989_v36, %v796_v59  ;;  %v1023_v13 = vpop.f32.mrb[16].mxu0 }
 0x11a   :  { %1413 = vst [vmem:[#allocation3] sm:$0xff] %v1349_v57  ;;  %v1351_v0 = vadd.f32 %v2148_v50, %v988_v58  ;;  %v1025_v16 = vpop.f32.mrb[17].mxu0 }
 0x11b   :  { %1414 = vst [vmem:[#allocation3 + $0x8] sm:$0xff] %v1350_v61  ;;  %v1352_v3 = vadd.f32 %v2150_v52, %v990_v62  ;;  %v1027_v18 = vpop.f32.mrb[18].mxu0 }
 0x11c   :  { %1415 = vst [vmem:[#allocation3 + $0x10] sm:$0xff] %v1351_v0  ;;  %v1029_v20 = vpop.f32.mrb[19].mxu0 }
 0x11d   :  { %1416 = vst [vmem:[#allocation3 + $0x18] sm:$0xff] %v1352_v3  ;;  %v800_v5 = vpop.f32.mrb[4].mxu1 }
 0x11e   :  { %v994_v6 = vadd.f32 %v993_v38, %v800_v5  ;;  %v802_v7 = vpop.f32.mrb[5].mxu1 }
 0x11f   :  { %v996_v8 = vadd.f32 %v995_v39, %v802_v7  ;;  %v804_v9 = vpop.f32.mrb[6].mxu1 }
 0x120   :  { %v1353_v10 = vadd.f32 %v2148_v50, %v994_v6  ;;  %v998_v11 = vadd.f32 %v997_v40, %v804_v9  ;;  %v806_v12 = vpop.f32.mrb[7].mxu1 }
 0x121   :  { %v1354_v14 = vadd.f32 %v2150_v52, %v996_v8  ;;  %v1000_v15 = vadd.f32 %v999_v41, %v806_v12  ;;  %v1033_v29 = vpop.f32.mrb[20].mxu0 }
 0x122   :  { %1417 = vst [vmem:[#allocation3 + $0x20] sm:$0xff] %v1353_v10  ;;  %v1355_v17 = vadd.f32 %v2148_v50, %v998_v11  ;;  %v1035_v31 = vpop.f32.mrb[21].mxu0 }
 0x123   :  { %1418 = vst [vmem:[#allocation3 + $0x28] sm:$0xff] %v1354_v14  ;;  %v1356_v19 = vadd.f32 %v2150_v52, %v1000_v15  ;;  %v1037_v33 = vpop.f32.mrb[22].mxu0 }
 0x124   :  { %1419 = vst [vmem:[#allocation3 + $0x30] sm:$0xff] %v1355_v17  ;;  %v1039_v35 = vpop.f32.mrb[23].mxu0 }
 0x125   :  { %1420 = vst [vmem:[#allocation3 + $0x38] sm:$0xff] %v1356_v19  ;;  %v810_v21 = vpop.f32.mrb[8].mxu1 }
 0x126   :  { %v1004_v22 = vadd.f32 %v1003_v44, %v810_v21  ;;  %v812_v23 = vpop.f32.mrb[9].mxu1 }
 0x127   :  { %v1006_v24 = vadd.f32 %v1005_v47, %v812_v23  ;;  %v814_v25 = vpop.f32.mrb[10].mxu1 }
 0x128   :  { %v1357_v26 = vadd.f32 %v2148_v50, %v1004_v22  ;;  %v1008_v27 = vadd.f32 %v1007_v48, %v814_v25  ;;  %v816_v28 = vpop.f32.mrb[11].mxu1 }
 0x129   :  { %v1358_v30 = vadd.f32 %v2150_v52, %v1006_v24  ;;  %v1010_v2 = vadd.f32 %v1009_v49, %v816_v28  ;;  %v1043_v44 = vpop.f32.mrb[24].mxu0 }
 0x12a   :  { %1421 = vst [vmem:[#allocation3 + $0x40] sm:$0xff] %v1357_v26  ;;  %v1359_v32 = vadd.f32 %v2148_v50, %v1008_v27  ;;  %v1045_v47 = vpop.f32.mrb[25].mxu0 }
 0x12b   :  { %1422 = vst [vmem:[#allocation3 + $0x48] sm:$0xff] %v1358_v30  ;;  %v1360_v34 = vadd.f32 %v2150_v52, %v1010_v2  ;;  %v1047_v49 = vpop.f32.mrb[26].mxu0 }
 0x12c   :  { %1423 = vst [vmem:[#allocation3 + $0x50] sm:$0xff] %v1359_v32  ;;  %v1049_v53 = vpop.f32.mrb[27].mxu0 }
 0x12d   :  { %1424 = vst [vmem:[#allocation3 + $0x58] sm:$0xff] %v1360_v34  ;;  %v820_v36 = vpop.f32.mrb[12].mxu1 }
 0x12e   :  { %v1014_v37 = vadd.f32 %v1013_v60, %v820_v36  ;;  %v822_v38 = vpop.f32.mrb[13].mxu1 }
 0x12f   :  { %v1016_v39 = vadd.f32 %v1015_v63, %v822_v38  ;;  %v824_v40 = vpop.f32.mrb[14].mxu1 }
 0x130   :  { %v1361_v41 = vadd.f32 %v2148_v50, %v1014_v37  ;;  %v1018_v42 = vadd.f32 %v1017_v1, %v824_v40  ;;  %v826_v43 = vpop.f32.mrb[15].mxu1 }
 0x131   :  { %v1362_v45 = vadd.f32 %v2150_v52, %v1016_v39  ;;  %v1020_v46 = vadd.f32 %v1019_v4, %v826_v43  ;;  %v1053_v62 = vpop.f32.mrb[28].mxu0 }
 0x132   :  { %1425 = vst [vmem:[#allocation3 + $0x60] sm:$0xff] %v1361_v41  ;;  %v1363_v48 = vadd.f32 %v2148_v50, %v1018_v42  ;;  %v1055_v1 = vpop.f32.mrb[29].mxu0 }
 0x133   :  { %1426 = vst [vmem:[#allocation3 + $0x68] sm:$0xff] %v1362_v45  ;;  %v1364_v51 = vadd.f32 %v2150_v52, %v1020_v46  ;;  %v1057_v4 = vpop.f32.mrb[30].mxu0 }
 0x134   :  { %1427 = vst [vmem:[#allocation3 + $0x70] sm:$0xff] %v1363_v48  ;;  %v1059_v6 = vpop.f32.mrb[31].mxu0 }
 0x135   :  { %1428 = vst [vmem:[#allocation3 + $0x78] sm:$0xff] %v1364_v51  ;;  %v830_v54 = vpop.f32.mrb[16].mxu1 }
 0x136   :  { %v1024_v55 = vadd.f32 %v1023_v13, %v830_v54  ;;  %v832_v56 = vpop.f32.mrb[17].mxu1 }
 0x137   :  { %v1026_v57 = vadd.f32 %v1025_v16, %v832_v56  ;;  %v834_v58 = vpop.f32.mrb[18].mxu1 }
 0x138   :  { %v1365_v59 = vadd.f32 %v2148_v50, %v1024_v55  ;;  %v1028_v60 = vadd.f32 %v1027_v18, %v834_v58  ;;  %v836_v61 = vpop.f32.mrb[19].mxu1 }
 0x139   :  { %v1366_v63 = vadd.f32 %v2150_v52, %v1026_v57  ;;  %v1030_v0 = vadd.f32 %v1029_v20, %v836_v61  ;;  %v1063_v15 = vpop.f32.mrb[32].mxu0 }
 0x13a   :  { %1429 = vst [vmem:[#allocation3 + $0x80] sm:$0xff] %v1365_v59  ;;  %v1367_v3 = vadd.f32 %v2148_v50, %v1028_v60  ;;  %v1065_v18 = vpop.f32.mrb[33].mxu0 }
 0x13b   :  { %1430 = vst [vmem:[#allocation3 + $0x88] sm:$0xff] %v1366_v63  ;;  %v1368_v5 = vadd.f32 %v2150_v52, %v1030_v0  ;;  %v1067_v20 = vpop.f32.mrb[34].mxu0 }
 0x13c   :  { %1431 = vst [vmem:[#allocation3 + $0x90] sm:$0xff] %v1367_v3  ;;  %v1069_v22 = vpop.f32.mrb[35].mxu0 }
 0x13d   :  { %1432 = vst [vmem:[#allocation3 + $0x98] sm:$0xff] %v1368_v5  ;;  %v840_v7 = vpop.f32.mrb[20].mxu1 }
 0x13e   :  { %v1034_v8 = vadd.f32 %v1033_v29, %v840_v7  ;;  %v842_v9 = vpop.f32.mrb[21].mxu1 }
 0x13f   :  { %v1036_v10 = vadd.f32 %v1035_v31, %v842_v9  ;;  %v844_v11 = vpop.f32.mrb[22].mxu1 }
 0x140   :  { %v1369_v12 = vadd.f32 %v2148_v50, %v1034_v8  ;;  %v1038_v13 = vadd.f32 %v1037_v33, %v844_v11  ;;  %v846_v14 = vpop.f32.mrb[23].mxu1 }
 0x141   :  { %v1370_v16 = vadd.f32 %v2150_v52, %v1036_v10  ;;  %v1040_v17 = vadd.f32 %v1039_v35, %v846_v14  ;;  %v1073_v2 = vpop.f32.mrb[36].mxu0 }
 0x142   :  { %1433 = vst [vmem:[#allocation3 + $0xa0] sm:$0xff] %v1369_v12  ;;  %v1371_v19 = vadd.f32 %v2148_v50, %v1038_v13  ;;  %v1075_v33 = vpop.f32.mrb[37].mxu0 }
 0x143   :  { %1434 = vst [vmem:[#allocation3 + $0xa8] sm:$0xff] %v1370_v16  ;;  %v1372_v21 = vadd.f32 %v2150_v52, %v1040_v17  ;;  %v1077_v35 = vpop.f32.mrb[38].mxu0 }
 0x144   :  { %1435 = vst [vmem:[#allocation3 + $0xb0] sm:$0xff] %v1371_v19  ;;  %v1079_v37 = vpop.f32.mrb[39].mxu0 }
 0x145   :  { %1436 = vst [vmem:[#allocation3 + $0xb8] sm:$0xff] %v1372_v21  ;;  %v850_v23 = vpop.f32.mrb[24].mxu1 }
 0x146   :  { %v1044_v24 = vadd.f32 %v1043_v44, %v850_v23  ;;  %v852_v25 = vpop.f32.mrb[25].mxu1 }
 0x147   :  { %v1046_v26 = vadd.f32 %v1045_v47, %v852_v25  ;;  %v854_v27 = vpop.f32.mrb[26].mxu1 }
 0x148   :  { %v1373_v28 = vadd.f32 %v2148_v50, %v1044_v24  ;;  %v1048_v29 = vadd.f32 %v1047_v49, %v854_v27  ;;  %v856_v30 = vpop.f32.mrb[27].mxu1 }
 0x149   :  { %v1374_v31 = vadd.f32 %v2150_v52, %v1046_v26  ;;  %v1050_v32 = vadd.f32 %v1049_v53, %v856_v30  ;;  %v1083_v46 = vpop.f32.mrb[40].mxu0 }
 0x14a   :  { %1437 = vst [vmem:[#allocation3 + $0xc0] sm:$0xff] %v1373_v28  ;;  %v1375_v34 = vadd.f32 %v2148_v50, %v1048_v29  ;;  %v1085_v49 = vpop.f32.mrb[41].mxu0 }
 0x14b   :  { %1438 = vst [vmem:[#allocation3 + $0xc8] sm:$0xff] %v1374_v31  ;;  %v1376_v36 = vadd.f32 %v2150_v52, %v1050_v32  ;;  %v1087_v53 = vpop.f32.mrb[42].mxu0 }
 0x14c   :  { %1439 = vst [vmem:[#allocation3 + $0xd0] sm:$0xff] %v1375_v34  ;;  %v1089_v55 = vpop.f32.mrb[43].mxu0 }
 0x14d   :  { %1440 = vst [vmem:[#allocation3 + $0xd8] sm:$0xff] %v1376_v36  ;;  %v860_v38 = vpop.f32.mrb[28].mxu1 }
 0x14e   :  { %v1054_v39 = vadd.f32 %v1053_v62, %v860_v38  ;;  %v862_v40 = vpop.f32.mrb[29].mxu1 }
 0x14f   :  { %v1056_v41 = vadd.f32 %v1055_v1, %v862_v40  ;;  %v864_v42 = vpop.f32.mrb[30].mxu1 }
 0x150   :  { %v1377_v43 = vadd.f32 %v2148_v50, %v1054_v39  ;;  %v1058_v44 = vadd.f32 %v1057_v4, %v864_v42  ;;  %v866_v45 = vpop.f32.mrb[31].mxu1 }
 0x151   :  { %v1378_v47 = vadd.f32 %v2150_v52, %v1056_v41  ;;  %v1060_v48 = vadd.f32 %v1059_v6, %v866_v45  ;;  %v1093_v0 = vpop.f32.mrb[44].mxu0 }
 0x152   :  { %1441 = vst [vmem:[#allocation3 + $0xe0] sm:$0xff] %v1377_v43  ;;  %v1379_v51 = vadd.f32 %v2148_v50, %v1058_v44  ;;  %v1095_v4 = vpop.f32.mrb[45].mxu0 }
 0x153   :  { %1442 = vst [vmem:[#allocation3 + $0xe8] sm:$0xff] %v1378_v47  ;;  %v1380_v54 = vadd.f32 %v2150_v52, %v1060_v48  ;;  %v1097_v6 = vpop.f32.mrb[46].mxu0 }
 0x154   :  { %1443 = vst [vmem:[#allocation3 + $0xf0] sm:$0xff] %v1379_v51  ;;  %v1099_v8 = vpop.f32.mrb[47].mxu0 }
 0x155   :  { %1444 = vst [vmem:[#allocation3 + $0xf8] sm:$0xff] %v1380_v54  ;;  %v870_v56 = vpop.f32.mrb[32].mxu1 }
 0x156   :  { %v1064_v57 = vadd.f32 %v1063_v15, %v870_v56  ;;  %v872_v58 = vpop.f32.mrb[33].mxu1 }
 0x157   :  { %v1066_v59 = vadd.f32 %v1065_v18, %v872_v58  ;;  %v874_v60 = vpop.f32.mrb[34].mxu1 }
 0x158   :  { %v1381_v61 = vadd.f32 %v2148_v50, %v1064_v57  ;;  %v1068_v62 = vadd.f32 %v1067_v20, %v874_v60  ;;  %v876_v63 = vpop.f32.mrb[35].mxu1 }
 0x159   :  { %v1382_v1 = vadd.f32 %v2150_v52, %v1066_v59  ;;  %v1070_v3 = vadd.f32 %v1069_v22, %v876_v63  ;;  %v1103_v17 = vpop.f32.mrb[48].mxu0 }
 0x15a   :  { %1445 = vst [vmem:[#allocation3 + $0x100] sm:$0xff] %v1381_v61  ;;  %v1383_v5 = vadd.f32 %v2148_v50, %v1068_v62  ;;  %v1105_v20 = vpop.f32.mrb[49].mxu0 }
 0x15b   :  { %1446 = vst [vmem:[#allocation3 + $0x108] sm:$0xff] %v1382_v1  ;;  %v1384_v7 = vadd.f32 %v2150_v52, %v1070_v3  ;;  %v1107_v22 = vpop.f32.mrb[50].mxu0 }
 0x15c   :  { %1447 = vst [vmem:[#allocation3 + $0x110] sm:$0xff] %v1383_v5  ;;  %v1109_v24 = vpop.f32.mrb[51].mxu0 }
 0x15d   :  { %1448 = vst [vmem:[#allocation3 + $0x118] sm:$0xff] %v1384_v7  ;;  %v880_v9 = vpop.f32.mrb[36].mxu1 }
 0x15e   :  { %v1074_v10 = vadd.f32 %v1073_v2, %v880_v9  ;;  %v882_v11 = vpop.f32.mrb[37].mxu1 }
 0x15f   :  { %v1076_v12 = vadd.f32 %v1075_v33, %v882_v11  ;;  %v884_v13 = vpop.f32.mrb[38].mxu1 }
 0x160   :  { %v1385_v14 = vadd.f32 %v2148_v50, %v1074_v10  ;;  %v1078_v15 = vadd.f32 %v1077_v35, %v884_v13  ;;  %v886_v16 = vpop.f32.mrb[39].mxu1 }
 0x161   :  { %v1386_v18 = vadd.f32 %v2150_v52, %v1076_v12  ;;  %v1080_v19 = vadd.f32 %v1079_v37, %v886_v16  ;;  %v1113_v32 = vpop.f32.mrb[52].mxu0 }
 0x162   :  { %1449 = vst [vmem:[#allocation3 + $0x120] sm:$0xff] %v1385_v14  ;;  %v1387_v21 = vadd.f32 %v2148_v50, %v1078_v15  ;;  %v1115_v35 = vpop.f32.mrb[53].mxu0 }
 0x163   :  { %1450 = vst [vmem:[#allocation3 + $0x128] sm:$0xff] %v1386_v18  ;;  %v1388_v23 = vadd.f32 %v2150_v52, %v1080_v19  ;;  %v1117_v37 = vpop.f32.mrb[54].mxu0 }
 0x164   :  { %1451 = vst [vmem:[#allocation3 + $0x130] sm:$0xff] %v1387_v21  ;;  %v1119_v39 = vpop.f32.mrb[55].mxu0 }
 0x165   :  { %1452 = vst [vmem:[#allocation3 + $0x138] sm:$0xff] %v1388_v23  ;;  %v890_v25 = vpop.f32.mrb[40].mxu1 }
 0x166   :  { %v1084_v26 = vadd.f32 %v1083_v46, %v890_v25  ;;  %v892_v27 = vpop.f32.mrb[41].mxu1 }
 0x167   :  { %v1086_v28 = vadd.f32 %v1085_v49, %v892_v27  ;;  %v894_v29 = vpop.f32.mrb[42].mxu1 }
 0x168   :  { %v1389_v30 = vadd.f32 %v2148_v50, %v1084_v26  ;;  %v1088_v2 = vadd.f32 %v1087_v53, %v894_v29  ;;  %v896_v31 = vpop.f32.mrb[43].mxu1 }
 0x169   :  { %v1390_v33 = vadd.f32 %v2150_v52, %v1086_v28  ;;  %v1090_v34 = vadd.f32 %v1089_v55, %v896_v31  ;;  %v1123_v48 = vpop.f32.mrb[56].mxu0 }
 0x16a   :  { %1453 = vst [vmem:[#allocation3 + $0x140] sm:$0xff] %v1389_v30  ;;  %v1391_v36 = vadd.f32 %v2148_v50, %v1088_v2  ;;  %v1125_v53 = vpop.f32.mrb[57].mxu0 }
 0x16b   :  { %1454 = vst [vmem:[#allocation3 + $0x148] sm:$0xff] %v1390_v33  ;;  %v1392_v38 = vadd.f32 %v2150_v52, %v1090_v34  ;;  %v1127_v55 = vpop.f32.mrb[58].mxu0 }
 0x16c   :  { %1455 = vst [vmem:[#allocation3 + $0x150] sm:$0xff] %v1391_v36  ;;  %v1129_v57 = vpop.f32.mrb[59].mxu0 }
 0x16d   :  { %1456 = vst [vmem:[#allocation3 + $0x158] sm:$0xff] %v1392_v38  ;;  %v900_v40 = vpop.f32.mrb[44].mxu1 }
 0x16e   :  { %v1094_v41 = vadd.f32 %v1093_v0, %v900_v40  ;;  %v902_v42 = vpop.f32.mrb[45].mxu1 }
 0x16f   :  { %v1096_v43 = vadd.f32 %v1095_v4, %v902_v42  ;;  %v904_v44 = vpop.f32.mrb[46].mxu1 }
 0x170   :  { %v1393_v45 = vadd.f32 %v2148_v50, %v1094_v41  ;;  %v1098_v46 = vadd.f32 %v1097_v6, %v904_v44  ;;  %v906_v47 = vpop.f32.mrb[47].mxu1 }
 0x171   :  { %v1394_v49 = vadd.f32 %v2150_v52, %v1096_v43  ;;  %v1100_v51 = vadd.f32 %v1099_v8, %v906_v47  ;;  %v1133_v3 = vpop.f32.mrb[60].mxu0 }
 0x172   :  { %1457 = vst [vmem:[#allocation3 + $0x160] sm:$0xff] %v1393_v45  ;;  %v1395_v54 = vadd.f32 %v2148_v50, %v1098_v46  ;;  %v1135_v6 = vpop.f32.mrb[61].mxu0 }
 0x173   :  { %1458 = vst [vmem:[#allocation3 + $0x168] sm:$0xff] %v1394_v49  ;;  %v1396_v56 = vadd.f32 %v2150_v52, %v1100_v51  ;;  %v1137_v8 = vpop.f32.mrb[62].mxu0 }
 0x174   :  { %1459 = vst [vmem:[#allocation3 + $0x170] sm:$0xff] %v1395_v54  ;;  %v1139_v10 = vpop.f32.mrb[63].mxu0 }
 0x175   :  { %1460 = vst [vmem:[#allocation3 + $0x178] sm:$0xff] %v1396_v56  ;;  %v910_v58 = vpop.f32.mrb[48].mxu1 }
 0x176   :  { %v1104_v59 = vadd.f32 %v1103_v17, %v910_v58  ;;  %v912_v60 = vpop.f32.mrb[49].mxu1 }
 0x177   :  { %v1106_v61 = vadd.f32 %v1105_v20, %v912_v60  ;;  %v914_v62 = vpop.f32.mrb[50].mxu1 }
 0x178   :  { %v1397_v63 = vadd.f32 %v2148_v50, %v1104_v59  ;;  %v1108_v0 = vadd.f32 %v1107_v22, %v914_v62  ;;  %v916_v1 = vpop.f32.mrb[51].mxu1 }
 0x179   :  { %v1398_v4 = vadd.f32 %v2150_v52, %v1106_v61  ;;  %v1110_v5 = vadd.f32 %v1109_v24, %v916_v1 }
 0x17a   :  { %1461 = vst [vmem:[#allocation3 + $0x180] sm:$0xff] %v1397_v63  ;;  %v1399_v7 = vadd.f32 %v2148_v50, %v1108_v0 }
 0x17b   :  { %1462 = vst [vmem:[#allocation3 + $0x188] sm:$0xff] %v1398_v4  ;;  %v1400_v9 = vadd.f32 %v2150_v52, %v1110_v5 }
 0x17c   :  { %1463 = vst [vmem:[#allocation3 + $0x190] sm:$0xff] %v1399_v7 }
 0x17d   :  { %1464 = vst [vmem:[#allocation3 + $0x198] sm:$0xff] %v1400_v9  ;;  %v920_v11 = vpop.f32.mrb[52].mxu1 }
 0x17e   :  { %v1114_v12 = vadd.f32 %v1113_v32, %v920_v11  ;;  %v922_v13 = vpop.f32.mrb[53].mxu1 }
 0x17f   :  { %v1116_v14 = vadd.f32 %v1115_v35, %v922_v13  ;;  %v924_v15 = vpop.f32.mrb[54].mxu1 }
 0x180   :  { %v1401_v16 = vadd.f32 %v2148_v50, %v1114_v12  ;;  %v1118_v17 = vadd.f32 %v1117_v37, %v924_v15  ;;  %v926_v18 = vpop.f32.mrb[55].mxu1 }
 0x181   :  { %v1402_v19 = vadd.f32 %v2150_v52, %v1116_v14  ;;  %v1120_v20 = vadd.f32 %v1119_v39, %v926_v18 }
 0x182   :  { %1465 = vst [vmem:[#allocation3 + $0x1a0] sm:$0xff] %v1401_v16  ;;  %v1403_v21 = vadd.f32 %v2148_v50, %v1118_v17 }
 0x183   :  { %1466 = vst [vmem:[#allocation3 + $0x1a8] sm:$0xff] %v1402_v19  ;;  %v1404_v22 = vadd.f32 %v2150_v52, %v1120_v20 }
 0x184   :  { %1467 = vst [vmem:[#allocation3 + $0x1b0] sm:$0xff] %v1403_v21 }
 0x185   :  { %1468 = vst [vmem:[#allocation3 + $0x1b8] sm:$0xff] %v1404_v22  ;;  %v930_v23 = vpop.f32.mrb[56].mxu1 }
 0x186   :  { %v1124_v24 = vadd.f32 %v1123_v48, %v930_v23  ;;  %v932_v25 = vpop.f32.mrb[57].mxu1 }
 0x187   :  { %v1126_v26 = vadd.f32 %v1125_v53, %v932_v25  ;;  %v934_v27 = vpop.f32.mrb[58].mxu1 }
 0x188   :  { %v1405_v28 = vadd.f32 %v2148_v50, %v1124_v24  ;;  %v1128_v29 = vadd.f32 %v1127_v55, %v934_v27  ;;  %v936_v30 = vpop.f32.mrb[59].mxu1 }
 0x189   :  { %v1406_v2 = vadd.f32 %v2150_v52, %v1126_v26  ;;  %v1130_v31 = vadd.f32 %v1129_v57, %v936_v30 }
 0x18a   :  { %1469 = vst [vmem:[#allocation3 + $0x1c0] sm:$0xff] %v1405_v28  ;;  %v1407_v32 = vadd.f32 %v2148_v50, %v1128_v29 }
 0x18b   :  { %1470 = vst [vmem:[#allocation3 + $0x1c8] sm:$0xff] %v1406_v2  ;;  %v1408_v33 = vadd.f32 %v2150_v52, %v1130_v31 }
 0x18c   :  { %1471 = vst [vmem:[#allocation3 + $0x1d0] sm:$0xff] %v1407_v32 }
 0x18d   :  { %1472 = vst [vmem:[#allocation3 + $0x1d8] sm:$0xff] %v1408_v33  ;;  %v940_v34 = vpop.f32.mrb[60].mxu1 }
 0x18e   :  { %v1134_v35 = vadd.f32 %v1133_v3, %v940_v34  ;;  %v942_v36 = vpop.f32.mrb[61].mxu1 }
 0x18f   :  { %v1136_v37 = vadd.f32 %v1135_v6, %v942_v36  ;;  %v944_v38 = vpop.f32.mrb[62].mxu1 }
 0x190   :  { %v1409_v39 = vadd.f32 %v2148_v50, %v1134_v35  ;;  %v1138_v40 = vadd.f32 %v1137_v8, %v944_v38  ;;  %v946_v41 = vpop.f32.mrb[63].mxu1 }
 0x191   :  { %v1410_v42 = vadd.f32 %v2150_v52, %v1136_v37  ;;  %v1140_v43 = vadd.f32 %v1139_v10, %v946_v41 }
 0x192   :  { %1473 = vst [vmem:[#allocation3 + $0x1e0] sm:$0xff] %v1409_v39  ;;  %v1411_v44 = vadd.f32 %v2148_v50, %v1138_v40 }
 0x193   :  { %1474 = vst [vmem:[#allocation3 + $0x1e8] sm:$0xff] %v1410_v42  ;;  %v1412_v45 = vadd.f32 %v2150_v52, %v1140_v43 }
 0x194   :  { %1475 = vst [vmem:[#allocation3 + $0x1f0] sm:$0xff] %v1411_v44 }
 0x195   :  { %1476 = vst [vmem:[#allocation3 + $0x1f8] sm:$0xff] %v1412_v45 }
 0x196   :  { %1804 = shalt.err (!%p1801_p4)
}
 0x197   :  { %s1805_s16 = scalar_lea.hbm %s2231_s3, 8192 }
 0x198   :  { %p1806_p5 = scmp.ne.s32.totalorder %s2231_s3, %s1805_s16  ;;  %p1809_p6 = scmp.lt.u32.totalorder %s1805_s16, %s2231_s3 }
 0x19a   :  { %p1811_p7 = pnand %p1809_p6, %p1806_p5 }
 0x19c   :  { %1814 = shalt.err (!%p1811_p7)
}
 0x19d   :  { %s1819_s21 = smov 256   ;;  %s1820_s22 = smov 16  }
 0x19e   :  { %1488 = dma.vmem_to_hbm [thread:$0]  %s1483_s2, 8192, %s2231_s3, [#allocation4], %s1819_s21, %s1819_s21, %s1820_s22  }
 0x19f   :  { %1815 = dma.done.wait [#allocation4], 8192  }
 0x1a0   :  { %1816 = vsyncadd [#allocation4], 4294959104 }
 0x1a1   :  { %1492 = vsyncpa [#allocation4], 1 }

</bundles_post_ra>
